<compile_context>
chip_gen: v5e
topology: v5e:2x2
jax: 0.10.0
libtpu: 0.0.40
codegen_flags: <defaults>
</compile_context>

<pallas_src>
import jax
import jax.numpy as jnp
from jax.experimental import pallas as pl
from jax.experimental.pallas import tpu as pltpu


def _latent_merge_kernel(x_ref, z_ref, wx_ref, wz_ref, b_ref, o_ref):
    # x_ref: (TILE, P*x_dim)   z_ref: (TILE, P*z_dim)   -- lane-packed slabs
    # wx_ref: (P*x_dim, P*x_dim), wz_ref: (P*z_dim, P*x_dim)  -- resident,
    #   block-diagonal packed weights (already transposed to (in, out))
    # b_ref: (1, P*x_dim) f32 tiled bias (resident)
    # o_ref: (TILE, P*x_dim)
    acc = jnp.dot(x_ref[...], wx_ref[...], preferred_element_type=jnp.float32)
    acc = acc + jnp.dot(z_ref[...], wz_ref[...],
                        preferred_element_type=jnp.float32)
    o_ref[...] = (acc + b_ref[...]).astype(o_ref.dtype)


def _round_up(n, m):
    return ((n + m - 1) // m) * m


def _block_diag(block, p):
    """p copies of `block` along the diagonal of a zero matrix."""
    if p == 1:
        return block
    r, c = block.shape
    out = jnp.zeros((p * r, p * c), block.dtype)
    for k in range(p):
        out = out.at[k * r:(k + 1) * r, k * c:(k + 1) * c].set(block)
    return out


def latent_merge(x, z, weight, bias, *, block_rows=8192):
    """Pallas implementation of LatentMerge.forward: Linear(cat(x, z, -1)).

    x:      (B, x_dim)
    z:      (B, z_dim)
    weight: (x_dim, x_dim + z_dim)   -- PyTorch nn.Linear layout (out, in)
    bias:   (x_dim,)
    block_rows: batch tile size measured in *original* rows (default 8192).
    Returns (B, x_dim) in x.dtype.  The MXU runs in x.dtype (weights are cast
    to match; they are tiny and resident); accumulation and the bias add are
    f32.
    """
    B, x_dim = x.shape
    Bz, z_dim = z.shape
    assert Bz == B
    in_dim = x_dim + z_dim
    assert weight.shape == (x_dim, in_dim)
    assert bias.shape == (x_dim,)

    out_dtype = x.dtype
    compute_dtype = x.dtype

    # Lane-packing factor: P logical rows of width x_dim share one 128-lane
    # row.  Falls back gracefully to P=1 (unpacked) when x_dim doesn't divide
    # 128 -- same code path, full-array-dim blocks keep the BlockSpecs legal.
    pack = 128 // x_dim if (x_dim <= 128 and 128 % x_dim == 0) else 1

    # Pad the batch to a multiple of the packing factor (zero rows, sliced off
    # at the end).  Costs an HBM copy only when B % pack != 0.
    b_pad = _round_up(B, pack)
    if b_pad != B:
        x = jnp.pad(x, ((0, b_pad - B), (0, 0)))
        z = jnp.pad(z, ((0, b_pad - B), (0, 0)))
    rows = b_pad // pack

    # Free row-major reshapes to lane-dense slabs.
    xp = x.reshape(rows, pack * x_dim)
    zp = z.reshape(rows, pack * z_dim)

    # Pre-split / pre-transpose the weight and expand to block-diagonal packed
    # form once in the wrapper; these stay resident in VMEM (constant index_map).
    w = weight.astype(compute_dtype)
    wx = _block_diag(w[:, :x_dim].T, pack)            # (P*x_dim, P*x_dim)
    wz = _block_diag(w[:, x_dim:].T, pack)            # (P*z_dim, P*x_dim)
    bb = jnp.tile(bias.astype(jnp.float32), pack).reshape(1, pack * x_dim)

    # Batch tiling (in packed rows).  Large tiles amortize per-step overhead.
    tile_cfg = max(_round_up(max(block_rows // pack, 1), 8), 8)
    tile = min(rows, tile_cfg)
    # Ensure >= 2 grid steps for large batches so the "parallel" axis can be
    # split across both v7x TensorCores; never shrink a tile below ~2048
    # original rows just to get a second step.
    min_split = max(_round_up(max(2048 // pack, 1), 8), 8)
    if rows >= 2 * min_split:
        tile = min(tile, _round_up(pl.cdiv(rows, 2), 8))
    grid = (pl.cdiv(rows, tile),)

    out = pl.pallas_call(
        _latent_merge_kernel,
        out_shape=jax.ShapeDtypeStruct((rows, pack * x_dim), out_dtype),
        grid_spec=pltpu.PrefetchScalarGridSpec(
            num_scalar_prefetch=0,
            grid=grid,
            in_specs=[
                pl.BlockSpec((tile, pack * x_dim), lambda i: (i, 0)),   # x slab
                pl.BlockSpec((tile, pack * z_dim), lambda i: (i, 0)),   # z slab
                pl.BlockSpec((pack * x_dim, pack * x_dim), lambda i: (0, 0)),  # W_x
                pl.BlockSpec((pack * z_dim, pack * x_dim), lambda i: (0, 0)),  # W_z
                pl.BlockSpec((1, pack * x_dim), lambda i: (0, 0)),      # bias
            ],
            out_specs=pl.BlockSpec((tile, pack * x_dim), lambda i: (i, 0)),
        ),
        compiler_params=pltpu.CompilerParams(
            dimension_semantics=("parallel",)),
    )(xp, zp, wx, wz, bb)

    out = out.reshape(b_pad, x_dim)
    if b_pad != B:
        out = out[:B]
    return out


if __name__ == "__main__":
    key = jax.random.PRNGKey(0)
    k_x, k_z, k_w, k_b = jax.random.split(key, 4)

    # Small shapes consistent with the module: batch=8, x_dim=32, z_dim=32.
    B, x_dim, z_dim = 8, 32, 32
    in_dim = x_dim + z_dim

    x = jax.random.normal(k_x, (B, x_dim), dtype=jnp.float32)
    z = jax.random.normal(k_z, (B, z_dim), dtype=jnp.float32)

    # Deterministic init mimicking nn.Linear's uniform(-1/sqrt(in), 1/sqrt(in)).
    bound = 1.0 / jnp.sqrt(jnp.float32(in_dim))
    weight = jax.random.uniform(k_w, (x_dim, in_dim), jnp.float32, -bound, bound)
    bias = jax.random.uniform(k_b, (x_dim,), jnp.float32, -bound, bound)

    ref = jnp.concatenate([x, z], axis=-1) @ weight.T + bias

    # 1) f32 path, single lane-packed tile.
    out = jax.block_until_ready(latent_merge(x, z, weight, bias))
    assert out.shape == (B, x_dim)
    assert jnp.allclose(out, ref, atol=1e-5, rtol=1e-5)

    # 2) Multi-step pipelined grid (small block_rows), partial last tile, and a
    #    batch that is not a multiple of the pack factor (exercises padding).
    B2 = 50
    x2 = jax.random.normal(k_x, (B2, x_dim), dtype=jnp.float32)
    z2 = jax.random.normal(k_z, (B2, z_dim), dtype=jnp.float32)
    ref2 = jnp.concatenate([x2, z2], axis=-1) @ weight.T + bias
    out2 = jax.block_until_ready(latent_merge(x2, z2, weight, bias, block_rows=16))
    assert out2.shape == (B2, x_dim)
    assert jnp.allclose(out2, ref2, atol=1e-5, rtol=1e-5)

    # 3) Asymmetric dims (z_dim != x_dim): packed z slab is 64 lanes wide.
    x_dim3, z_dim3 = 32, 16
    x3 = jax.random.normal(k_x, (B, x_dim3), dtype=jnp.float32)
    z3 = jax.random.normal(k_z, (B, z_dim3), dtype=jnp.float32)
    bound3 = 1.0 / jnp.sqrt(jnp.float32(x_dim3 + z_dim3))
    w3 = jax.random.uniform(k_w, (x_dim3, x_dim3 + z_dim3), jnp.float32,
                            -bound3, bound3)
    b3 = jax.random.uniform(k_b, (x_dim3,), jnp.float32, -bound3, bound3)
    ref3 = jnp.concatenate([x3, z3], axis=-1) @ w3.T + b3
    out3 = jax.block_until_ready(latent_merge(x3, z3, w3, b3))
    assert jnp.allclose(out3, ref3, atol=1e-5, rtol=1e-5)

    # 4) bf16 activations from the "producer" (weights cast to match in the
    #    wrapper; MXU accumulation and the bias add stay f32).
    out_bf16 = jax.block_until_ready(
        latent_merge(x.astype(jnp.bfloat16), z.astype(jnp.bfloat16), weight, bias))
    assert out_bf16.dtype == jnp.bfloat16
    assert jnp.allclose(out_bf16.astype(jnp.float32), ref, atol=5e-2, rtol=5e-2)

    print("KERNEL_OK")
</pallas_src>

<mosaic_0001>
module attributes {stable_mosaic.version = 11 : i64} {
  func.func @_latent_merge_kernel(%arg0: i32, %arg1: memref<2x128xf32, #tpu.memory_space<vmem>>, %arg2: memref<2x128xf32, #tpu.memory_space<vmem>>, %arg3: memref<128x128xf32, #tpu.memory_space<vmem>>, %arg4: memref<128x128xf32, #tpu.memory_space<vmem>>, %arg5: memref<1x128xf32, #tpu.memory_space<vmem>>, %arg6: memref<2x128xf32, #tpu.memory_space<vmem>>) attributes {dimension_semantics = [#tpu.dimension_semantics<parallel>], iteration_bounds = array<i64: 1>, scalar_prefetch = 0 : i64, scratch_operands = 0 : i64, tpu.core_type = #tpu.core_type<tc>, window_params = [{transform_indices = @transform_0, window_bounds = array<i64: 2, 128>}, {transform_indices = @transform_1, window_bounds = array<i64: 2, 128>}, {pipeline_mode = #tpu.pipeline_mode<synchronous>, transform_indices = @transform_2, window_bounds = array<i64: 128, 128>}, {pipeline_mode = #tpu.pipeline_mode<synchronous>, transform_indices = @transform_3, window_bounds = array<i64: 128, 128>}, {pipeline_mode = #tpu.pipeline_mode<synchronous>, transform_indices = @transform_4, window_bounds = array<i64: 1, 128>}, {transform_indices = @transform_5, window_bounds = array<i64: 2, 128>}]} {
    %c0 = arith.constant 0 : index
    %c0_0 = arith.constant 0 : index
    %0 = vector.load %arg1[%c0, %c0_0] : memref<2x128xf32, #tpu.memory_space<vmem>>, vector<2x128xf32>
    %c0_1 = arith.constant 0 : index
    %c0_2 = arith.constant 0 : index
    %1 = vector.load %arg3[%c0_1, %c0_2] : memref<128x128xf32, #tpu.memory_space<vmem>>, vector<128x128xf32>
    %cst = arith.constant dense<0.000000e+00> : vector<2x128xf32>
    %2 = tpu.matmul %0, %1, %cst {dimension_numbers = #tpu.dot_dimension_numbers<[1], [0], [0], [1], [0, 0, 1, 1], [], []>} : vector<2x128xf32>, vector<128x128xf32>, vector<2x128xf32> -> vector<2x128xf32>
    %c0_3 = arith.constant 0 : index
    %c0_4 = arith.constant 0 : index
    %3 = vector.load %arg2[%c0_3, %c0_4] : memref<2x128xf32, #tpu.memory_space<vmem>>, vector<2x128xf32>
    %c0_5 = arith.constant 0 : index
    %c0_6 = arith.constant 0 : index
    %4 = vector.load %arg4[%c0_5, %c0_6] : memref<128x128xf32, #tpu.memory_space<vmem>>, vector<128x128xf32>
    %cst_7 = arith.constant dense<0.000000e+00> : vector<2x128xf32>
    %5 = tpu.matmul %3, %4, %cst_7 {dimension_numbers = #tpu.dot_dimension_numbers<[1], [0], [0], [1], [0, 0, 1, 1], [], []>} : vector<2x128xf32>, vector<128x128xf32>, vector<2x128xf32> -> vector<2x128xf32>
    %6 = arith.addf %2, %5 : vector<2x128xf32>
    %c0_8 = arith.constant 0 : index
    %c0_9 = arith.constant 0 : index
    %7 = vector.load %arg5[%c0_8, %c0_9] : memref<1x128xf32, #tpu.memory_space<vmem>>, vector<1x128xf32>
    %8 = vector.broadcast %7 : vector<1x128xf32> to vector<2x128xf32>
    %9 = arith.addf %6, %8 : vector<2x128xf32>
    %c0_10 = arith.constant 0 : index
    %c0_11 = arith.constant 0 : index
    %10 = vector.load %arg6[%c0_10, %c0_11] : memref<2x128xf32, #tpu.memory_space<vmem>>, vector<2x128xf32>
    tpu.vector_store %arg6[%c0_10, %c0_11], %9 {strides = array<i32>} : memref<2x128xf32, #tpu.memory_space<vmem>>, vector<2x128xf32>,
    return
  }
  func.func @transform_0(%arg0: i32) -> (i32, i32) {
    %c0_i32 = arith.constant 0 : i32
    %c0_i32_0 = arith.constant 0 : i32
    return %arg0, %c0_i32 : i32, i32
  }
  func.func @transform_1(%arg0: i32) -> (i32, i32) {
    %c0_i32 = arith.constant 0 : i32
    %c0_i32_0 = arith.constant 0 : i32
    return %arg0, %c0_i32 : i32, i32
  }
  func.func @transform_2(%arg0: i32) -> (i32, i32) {
    %c0_i32 = arith.constant 0 : i32
    %c0_i32_0 = arith.constant 0 : i32
    %c0_i32_1 = arith.constant 0 : i32
    return %c0_i32, %c0_i32_0 : i32, i32
  }
  func.func @transform_3(%arg0: i32) -> (i32, i32) {
    %c0_i32 = arith.constant 0 : i32
    %c0_i32_0 = arith.constant 0 : i32
    %c0_i32_1 = arith.constant 0 : i32
    return %c0_i32, %c0_i32_0 : i32, i32
  }
  func.func @transform_4(%arg0: i32) -> (i32, i32) {
    %c0_i32 = arith.constant 0 : i32
    %c0_i32_0 = arith.constant 0 : i32
    %c0_i32_1 = arith.constant 0 : i32
    return %c0_i32, %c0_i32_0 : i32, i32
  }
  func.func @transform_5(%arg0: i32) -> (i32, i32) {
    %c0_i32 = arith.constant 0 : i32
    %c0_i32_0 = arith.constant 0 : i32
    return %arg0, %c0_i32 : i32, i32
  }
}

</mosaic_0001>

<bundles_post_ra>
// kernel: tpu_custom_call.1
= control target key start
LH: loop header
LB: loop body
LE: loop exit
PB: predicated region body
PF: predicated region fallthrough
CT: control target
= control target key end

     0   :  { %10 = vsyncpa [#allocation3], 0  ;;  %s370_s0 = inlined_call_operand.hbm [shape: f32[2,128], index: 0, kind: input, shape index: {}]   ;;  %s371_s1 = inlined_call_operand.hbm [shape: f32[2,128], index: 1, kind: input, shape index: {}]   ;;  %s372_s2 = inlined_call_operand.hbm [shape: f32[128,128], index: 2, kind: input, shape index: {}]   ;;  %s373_s3 = inlined_call_operand.hbm [shape: f32[128,128], index: 3, kind: input, shape index: {}]   ;;  %s374_s4 = inlined_call_operand.vmem [shape: f32[1,128], index: 4, kind: input, shape index: {}]   ;;  %s375_s5 = inlined_call_operand.hbm [shape: f32[2,128], index: 5, kind: output, shape index: {}]  }
   0x1   :  { %11 = vsyncpa [#allocation6], 0 }
   0x2   :  { %12 = vsyncpa [#allocation9], 0  ;;  %s30_s20 = sshll.u32 %s371_s1, 4  ;;  %s31_s20 = int_to_ptr.hbm [resolvable:$true] %s30_s20 }
   0x3   :  { %13 = vsyncpa [#allocation4], 0  ;;  %s315_s21 = smov [#allocation5]   ;;  %s19_s25 = sshll.u32 %s370_s0, 4  ;;  %s20_s25 = int_to_ptr.hbm [resolvable:$true] %s19_s25 }
   0x4   :  { %s32_s22 = sshll.u32 %s315_s21, 4  ;;  %s316_s26 = smov [#allocation2]   ;;  %s33_s22 = int_to_ptr.vmem [resolvable:$true] %s32_s22 }
   0x5   :  { %35 = dma.hbm_to_vmem [thread:$0]  %s31_s20, 32, %s33_s22, [#allocation6]  }
   0x6   :  { %s21_s27 = sshll.u32 %s316_s26, 4  ;;  %s40_s30 = sshll.u32 %s372_s2, 4  ;;  %s22_s27 = int_to_ptr.vmem [resolvable:$true] %s21_s27  ;;  %s41_s30 = int_to_ptr.hbm [resolvable:$true] %s40_s30 }
   0x7   :  { %24 = dma.hbm_to_vmem [thread:$0]  %s20_s25, 32, %s22_s27, [#allocation3]  }
   0x8   :  { %s317_s1 = smov [#allocation7]   ;;  %s53_s9 = sshll.u32 %s373_s3, 4  ;;  %s54_s9 = int_to_ptr.hbm [resolvable:$true] %s53_s9 }
   0x9   :  { %s42_s6 = sshll.u32 %s317_s1, 4  ;;  %s318_s10 = smov 128   ;;  %s43_s6 = int_to_ptr.vmem [resolvable:$true] %s42_s6 }
   0xa   :  { %s319_s0 = smov 8   ;;  %s320_s11 = smov [#allocation8]  }
   0xb   :  { %48 = dma.hbm_to_vmem [thread:$0]  %s41_s30, 2048, %s43_s6, [#allocation6], %s318_s10, %s318_s10, %s319_s0  }
   0xc   :  { %s55_s12 = sshll.u32 %s320_s11, 4  ;;  %s56_s12 = int_to_ptr.vmem [resolvable:$true] %s55_s12 }
   0xd   :  { %61 = dma.hbm_to_vmem [thread:$0]  %s54_s9, 2048, %s56_s12, [#allocation9], %s318_s10, %s318_s10, %s319_s0  }
   0xe   :  { %307 = dma.done.wait [#allocation3], 32  }
   0xf   :  { %308 = vsyncadd [#allocation3], 4294967264 }
  0x10   :  { %309 = dma.done.wait [#allocation6], 2080  }
  0x11   :  { %310 = vsyncadd [#allocation6], 4294965216 }
  0x12   :  { %311 = dma.done.wait [#allocation9], 2048  }
  0x13   :  { %312 = vsyncadd [#allocation9], 4294965248  ;;  %v113_v0 = vld [vmem:[#allocation8 + $0x78] sm:$0xff]  ;;  %v112_v2 = vld [vmem:[#allocation8 + $0x70] sm:$0xff]  ;;  %s321_s13 = smov [#allocation10]   ;;  %s167_s17 = sshll.u32 %s375_s5, 4  ;;  %s168_s17 = int_to_ptr.hbm [resolvable:$true] %s167_s17 }
  0x14   :  { %v96_v1 = vld [vmem:[#allocation7 + $0x78] sm:$0xff]  ;;  %114 = vmatpush.msra.mxu0 %v113_v0  ;;  %v95_v3 = vld [vmem:[#allocation7 + $0x70] sm:$0xff]  ;;  %v111_v4 = vld [vmem:[#allocation8 + $0x68] sm:$0xff]  ;;  %s165_s14 = sshll.u32 %s321_s13, 4  ;;  %s166_s14 = int_to_ptr.vmem [resolvable:$true] %s165_s14 }
  0x15   :  { %134 = vmatpush.msra.mxu1 %v96_v1  ;;  %v94_v5 = vld [vmem:[#allocation7 + $0x68] sm:$0xff]  ;;  %v110_v6 = vld [vmem:[#allocation8 + $0x60] sm:$0xff]  ;;  %v109_v8 = vld [vmem:[#allocation8 + $0x58] sm:$0xff] }
  0x16   :  { %115 = vmatpush.msra.mxu0 %v112_v2  ;;  %v93_v7 = vld [vmem:[#allocation7 + $0x60] sm:$0xff]  ;;  %v92_v9 = vld [vmem:[#allocation7 + $0x58] sm:$0xff]  ;;  %v108_v10 = vld [vmem:[#allocation8 + $0x50] sm:$0xff] }
  0x17   :  { %135 = vmatpush.msra.mxu1 %v95_v3  ;;  %v91_v11 = vld [vmem:[#allocation7 + $0x50] sm:$0xff]  ;;  %v107_v12 = vld [vmem:[#allocation8 + $0x48] sm:$0xff]  ;;  %v106_v14 = vld [vmem:[#allocation8 + $0x40] sm:$0xff] }
  0x18   :  { %116 = vmatpush.msra.mxu0 %v111_v4  ;;  %v90_v13 = vld [vmem:[#allocation7 + $0x48] sm:$0xff]  ;;  %v89_v15 = vld [vmem:[#allocation7 + $0x40] sm:$0xff]  ;;  %v105_v16 = vld [vmem:[#allocation8 + $0x38] sm:$0xff] }
  0x19   :  { %136 = vmatpush.msra.mxu1 %v94_v5  ;;  %v88_v17 = vld [vmem:[#allocation7 + $0x38] sm:$0xff]  ;;  %v104_v18 = vld [vmem:[#allocation8 + $0x30] sm:$0xff]  ;;  %v103_v20 = vld [vmem:[#allocation8 + $0x28] sm:$0xff] }
  0x1a   :  { %117 = vmatpush.msra.mxu0 %v110_v6  ;;  %v87_v19 = vld [vmem:[#allocation7 + $0x30] sm:$0xff]  ;;  %v86_v21 = vld [vmem:[#allocation7 + $0x28] sm:$0xff]  ;;  %v102_v22 = vld [vmem:[#allocation8 + $0x20] sm:$0xff] }
  0x1b   :  { %137 = vmatpush.msra.mxu1 %v93_v7  ;;  %v85_v23 = vld [vmem:[#allocation7 + $0x20] sm:$0xff]  ;;  %v101_v24 = vld [vmem:[#allocation8 + $0x18] sm:$0xff]  ;;  %v100_v26 = vld [vmem:[#allocation8 + $0x10] sm:$0xff] }
  0x1c   :  { %118 = vmatpush.msra.mxu0 %v109_v8  ;;  %v84_v25 = vld [vmem:[#allocation7 + $0x18] sm:$0xff]  ;;  %v83_v27 = vld [vmem:[#allocation7 + $0x10] sm:$0xff]  ;;  %v99_v28 = vld [vmem:[#allocation8 + $0x8] sm:$0xff] }
  0x1d   :  { %138 = vmatpush.msra.mxu1 %v92_v9  ;;  %v82_v29 = vld [vmem:[#allocation7 + $0x8] sm:$0xff]  ;;  %v98_v30 = vld [vmem:[#allocation8] sm:$0xff]  ;;  %v97_v32 = vld [vmem:[#allocation5] sm:$0x3] }
  0x1e   :  { %119 = vmatpush.msra.mxu0 %v108_v10  ;;  %v81_v31 = vld [vmem:[#allocation7] sm:$0xff]  ;;  %v80_v33 = vld [vmem:[#allocation2] sm:$0x3] }
  0x1f   :  { %139 = vmatpush.msra.mxu1 %v91_v11  ;;  %v186_v34 = vld [vmem:[%s374_s4] ss:$0 sm:$0xff] }
  0x20   :  { %120 = vmatpush.msra.mxu0 %v107_v12 }
  0x21   :  { %140 = vmatpush.msra.mxu1 %v90_v13 }
  0x22   :  { %121 = vmatpush.msra.mxu0 %v106_v14 }
  0x23   :  { %141 = vmatpush.msra.mxu1 %v89_v15 }
  0x24   :  { %122 = vmatpush.msra.mxu0 %v105_v16 }
  0x25   :  { %142 = vmatpush.msra.mxu1 %v88_v17 }
  0x26   :  { %123 = vmatpush.msra.mxu0 %v104_v18 }
  0x27   :  { %143 = vmatpush.msra.mxu1 %v87_v19 }
  0x28   :  { %124 = vmatpush.msra.mxu0 %v103_v20 }
  0x29   :  { %144 = vmatpush.msra.mxu1 %v86_v21 }
  0x2a   :  { %125 = vmatpush.msra.mxu0 %v102_v22 }
  0x2b   :  { %145 = vmatpush.msra.mxu1 %v85_v23 }
  0x2c   :  { %126 = vmatpush.msra.mxu0 %v101_v24 }
  0x2d   :  { %146 = vmatpush.msra.mxu1 %v84_v25 }
  0x2e   :  { %127 = vmatpush.msra.mxu0 %v100_v26 }
  0x2f   :  { %147 = vmatpush.msra.mxu1 %v83_v27 }
  0x30   :  { %128 = vmatpush.msra.mxu0 %v99_v28 }
  0x31   :  { %148 = vmatpush.msra.mxu1 %v82_v29 }
  0x32   :  { %129 = vmatpush.msra.mxu0 %v98_v30 }
  0x33   :  { %149 = vmatpush.msra.mxu1 %v81_v31  ;;  %130 = vmatmul.f32.vlgmr.msra.gmra.mxu0 %v97_v32 }
  0x34   :  { %150 = vmatmul.f32.vlgmr.msra.gmra.mxu1 %v80_v33 }
  0xb0   :  { %v131_v35 = vpop.f32.mrf.mxu0 }
  0xb1   :  { %v151_v36 = vpop.f32.mrf.mxu1 }
  0xb2   :  { %v152_v37 = vadd.f32 %v151_v36, %v131_v35 }
  0xb4   :  { %v158_v38 = vadd.f32 %v186_v34, %v152_v37 }
  0xb6   :  { %159 = vst [vmem:[#allocation10] sm:$0x3] %v158_v38 }
  0xb7   :  { %170 = dma.vmem_to_hbm [thread:$0]  %s166_s14, 32, %s168_s17, [#allocation4]  }
  0xb8   :  { %313 = dma.done.wait [#allocation4], 32  }
  0xb9   :  { %314 = vsyncadd [#allocation4], 4294967264 }
  0xba   :  { %175 = vsyncpa [#allocation3], 1 }
  0xbb   :  { %176 = vsyncpa [#allocation6], 1 }
  0xbc   :  { %177 = vsyncpa [#allocation9], 1 }
  0xbd   :  { %178 = vsyncpa [#allocation4], 1 }

</bundles_post_ra>
